<compile_context>
chip_gen: v5e
topology: v5e:2x2
jax: 0.10.0
libtpu: 0.0.40
codegen_flags: <defaults>
</compile_context>

<pallas_src>
import math
import numpy as np
import jax
import jax.numpy as jnp
from jax import lax
from jax.experimental import pallas as pl
from jax.experimental.pallas import tpu as pltpu


# ---------------------------------------------------------------------------
# Parameter setup + offline operator fusion (plain numpy / JAX glue)
# ---------------------------------------------------------------------------
def hadamard_matrix(n: int) -> np.ndarray:
    """Sylvester (unnormalized, +-1) Hadamard matrix of size n (power of 2)."""
    H = np.array([[1.0]])
    while H.shape[0] < n:
        H = np.block([[H, H], [H, -H]])
    return H


def make_fastfood_params(key, in_size: int, out_size: int):
    m = int(math.ceil(math.log2(in_size)))
    E = 1 << m                                   # in_size_extended
    nstack = int(math.ceil(out_size / E))
    n = nstack * E

    k_p, k_b, k_g, k_s, k_bias = jax.random.split(key, 5)
    P = jax.random.permutation(k_p, n)                                   # torch.randperm(n)
    Bp = (0.1 * jax.random.normal(k_b, (nstack, E))).astype(jnp.float32)
    Gp = (0.1 * jax.random.normal(k_g, (nstack, E))).astype(jnp.float32)
    Sp = (0.1 * jax.random.normal(k_s, (nstack, E))).astype(jnp.float32)
    bound = 1.0 / math.sqrt(in_size)
    bias = jax.random.uniform(k_bias, (out_size,), jnp.float32, -bound, bound)

    # ---- offline fusion of the whole linear chain into one (in_size, out_size) op ----
    H = hadamard_matrix(E)                       # symmetric: FWHT(row) == row @ H
    assert np.array_equal(H, H.T), "FWHT-as-right-matmul relies on H being symmetric"
    P_np = np.asarray(P)
    Bf = np.asarray(Bp, np.float64).reshape(n)
    Gf = np.asarray(Gp, np.float64).reshape(n)
    Sf = np.asarray(Sp, np.float64).reshape(n)

    def fwht_right(A):  # apply per-stack FWHT as a right operator on (E, n)
        return np.einsum("jse,fe->jsf", A.reshape(E, nstack, E), H).reshape(E, n)

    R = np.tile(np.eye(E), (1, nstack))          # replicate: x_rep = x @ R,  (E, n)
    W = R * Bf[None, :]                          # @ diag(Bflat)
    W = fwht_right(W)                            # @ Hblk        (FWHT #1)
    W = W[:, P_np]                               # @ Pmat        (column permutation)
    W = W * Gf[None, :]                          # @ diag(Gflat)
    W = fwht_right(W)                            # @ Hblk        (FWHT #2)
    W = W * Sf[None, :]                          # @ diag(Sflat)
    # zero-padded input rows beyond in_size and output cols beyond out_size drop out:
    W = W[:in_size, :out_size]

    params = dict(
        in_size=in_size, out_size=out_size, E=E, nstack=nstack, n=n,
        P=P, Bp=Bp, Gp=Gp, Sp=Sp, bias=bias,
        H=jnp.asarray(H, jnp.float32),
        W=jnp.asarray(W, jnp.float32),                  # fused operator (in_size, out_size)
        bias2d=bias.reshape(1, out_size),
    )
    return params


# ---------------------------------------------------------------------------
# Pallas kernel: one MXU matmul + bias add per batch tile
# ---------------------------------------------------------------------------
def fastfood_kernel(x_ref, w_ref, b_ref, o_ref):
    o_ref[...] = jnp.dot(x_ref[...], w_ref[...],
                         preferred_element_type=jnp.float32) + b_ref[...]


def _round_up(a: int, b: int) -> int:
    return (a + b - 1) // b * b


def fastfood_forward(params, x, *, bm=None):
    """x: (batch, in_size) f32 -> (batch, out_size) f32."""
    in_size, out_size = params["in_size"], params["out_size"]
    W, bias2d = params["W"], params["bias2d"]
    batch = x.shape[0]

    # Large batch tiles to fill MXU rows; sublane-aligned; arbitrary batch via padding.
    if bm is None:
        bm = min(256, _round_up(batch, 8))
    padded = _round_up(batch, bm)

    xp = x.astype(jnp.float32)
    if padded != batch:
        xp = jnp.pad(xp, ((0, padded - batch), (0, 0)))

    grid = (padded // bm,)
    flops = 2 * padded * in_size * out_size
    bytes_accessed = 4 * (padded * (in_size + out_size) + in_size * out_size + out_size)
    # double-buffered x/out tiles + resident grid-invariant W & bias, 2x headroom
    vmem_bytes = 4 * (2 * bm * (in_size + out_size) + 2 * in_size * out_size + 2 * out_size)
    vmem_limit = min(max(2 * vmem_bytes, 1 << 20), 64 << 20)

    out = pl.pallas_call(
        fastfood_kernel,
        out_shape=jax.ShapeDtypeStruct((padded, out_size), jnp.float32),
        grid=grid,
        in_specs=[
            pl.BlockSpec((bm, in_size), lambda i: (i, 0)),        # x, tiled over batch
            pl.BlockSpec((in_size, out_size), lambda i: (0, 0)),  # fused operator (grid-invariant)
            pl.BlockSpec((1, out_size), lambda i: (0, 0)),        # bias (grid-invariant)
        ],
        out_specs=pl.BlockSpec((bm, out_size), lambda i: (i, 0)),
        compiler_params=pltpu.CompilerParams(
            dimension_semantics=("parallel",),
            vmem_limit_bytes=vmem_limit),
        cost_estimate=pl.CostEstimate(flops=flops, transcendentals=0,
                                      bytes_accessed=bytes_accessed),
    )(xp, W, bias2d)

    return out if padded == batch else out[:batch]


# ---------------------------------------------------------------------------
# Pure-JAX reference (mirrors the PyTorch forward semantics exactly)
# ---------------------------------------------------------------------------
def fastfood_reference(params, x):
    in_size, out_size = params["in_size"], params["out_size"]
    E, nstack, n = params["E"], params["nstack"], params["n"]
    batch = x.shape[0]
    H = params["H"]
    hp = lax.Precision.HIGHEST
    xp = jnp.pad(x.astype(jnp.float32), ((0, 0), (0, E - in_size)))           # pre_process
    z1 = params["Bp"][None, :, :] * xp[:, None, :]                            # _diag_first
    z2 = jnp.einsum("bse,fe->bsf", z1, H, precision=hp)                       # FWHT (cyfht)
    z3 = z2.reshape(batch, n)[:, params["P"]]                                 # _perm_trans
    z4 = params["Gp"].reshape(1, n) * z3                                      # _diag_secend
    z5 = jnp.einsum("bse,fe->bsf", z4.reshape(batch, nstack, E), H,
                    precision=hp)                                             # FWHT (cyfht)
    z7 = params["Sp"].reshape(1, n) * z5.reshape(batch, n)                    # _diag_third
    return z7[:, :out_size] + params["bias"]                                  # post_process


# ---------------------------------------------------------------------------
if __name__ == "__main__":
    key = jax.random.PRNGKey(0)
    k_param, k_x, k_x2 = jax.random.split(key, 3)

    in_size, out_size, batch = 100, 300, 16      # -> E=128, nstack=3, n=384
    params = make_fastfood_params(k_param, in_size, out_size)

    x = jax.random.normal(k_x, (batch, in_size), jnp.float32)
    out = jax.block_until_ready(fastfood_forward(params, x))
    ref = fastfood_reference(params, x)
    assert out.shape == (batch, out_size), out.shape
    np.testing.assert_allclose(np.asarray(out), np.asarray(ref),
                               rtol=1e-4, atol=1e-5)

    # non-multiple batch exercises the row-padding path (no hard assert anymore)
    x2 = jax.random.normal(k_x2, (13, in_size), jnp.float32)
    out2 = jax.block_until_ready(fastfood_forward(params, x2))
    ref2 = fastfood_reference(params, x2)
    assert out2.shape == (13, out_size), out2.shape
    np.testing.assert_allclose(np.asarray(out2), np.asarray(ref2),
                               rtol=1e-4, atol=1e-5)

    print("KERNEL_OK")
</pallas_src>

<mosaic_0001>
module attributes {stable_mosaic.version = 11 : i64} {
  func.func @fastfood_kernel(%arg0: i32, %arg1: memref<16x100xf32, #tpu.memory_space<vmem>>, %arg2: memref<100x300xf32, #tpu.memory_space<vmem>>, %arg3: memref<1x300xf32, #tpu.memory_space<vmem>>, %arg4: memref<16x300xf32, #tpu.memory_space<vmem>>) attributes {dimension_semantics = [#tpu.dimension_semantics<parallel>], iteration_bounds = array<i64: 1>, scalar_prefetch = 0 : i64, scratch_operands = 0 : i64, tpu.core_type = #tpu.core_type<tc>, window_params = [{transform_indices = @transform_0, window_bounds = array<i64: 16, 100>}, {pipeline_mode = #tpu.pipeline_mode<synchronous>, transform_indices = @transform_1, window_bounds = array<i64: 100, 300>}, {pipeline_mode = #tpu.pipeline_mode<synchronous>, transform_indices = @transform_2, window_bounds = array<i64: 1, 300>}, {transform_indices = @transform_3, window_bounds = array<i64: 16, 300>}]} {
    %c0 = arith.constant 0 : index
    %c0_0 = arith.constant 0 : index
    %0 = vector.load %arg1[%c0, %c0_0] : memref<16x100xf32, #tpu.memory_space<vmem>>, vector<16x100xf32>
    %c0_1 = arith.constant 0 : index
    %c0_2 = arith.constant 0 : index
    %1 = vector.load %arg2[%c0_1, %c0_2] : memref<100x300xf32, #tpu.memory_space<vmem>>, vector<100x300xf32>
    %cst = arith.constant dense<0.000000e+00> : vector<16x300xf32>
    %2 = tpu.matmul %0, %1, %cst {dimension_numbers = #tpu.dot_dimension_numbers<[1], [0], [0], [1], [0, 0, 1, 1], [], []>} : vector<16x100xf32>, vector<100x300xf32>, vector<16x300xf32> -> vector<16x300xf32>
    %c0_3 = arith.constant 0 : index
    %c0_4 = arith.constant 0 : index
    %3 = vector.load %arg3[%c0_3, %c0_4] : memref<1x300xf32, #tpu.memory_space<vmem>>, vector<1x300xf32>
    %4 = vector.broadcast %3 : vector<1x300xf32> to vector<16x300xf32>
    %5 = arith.addf %2, %4 : vector<16x300xf32>
    %c0_5 = arith.constant 0 : index
    %c0_6 = arith.constant 0 : index
    %6 = vector.load %arg4[%c0_5, %c0_6] : memref<16x300xf32, #tpu.memory_space<vmem>>, vector<16x300xf32>
    tpu.vector_store %arg4[%c0_5, %c0_6], %5 {strides = array<i32>} : memref<16x300xf32, #tpu.memory_space<vmem>>, vector<16x300xf32>,
    return
  }
  func.func @transform_0(%arg0: i32) -> (i32, i32) {
    %c0_i32 = arith.constant 0 : i32
    %c0_i32_0 = arith.constant 0 : i32
    return %arg0, %c0_i32 : i32, i32
  }
  func.func @transform_1(%arg0: i32) -> (i32, i32) {
    %c0_i32 = arith.constant 0 : i32
    %c0_i32_0 = arith.constant 0 : i32
    %c0_i32_1 = arith.constant 0 : i32
    return %c0_i32, %c0_i32_0 : i32, i32
  }
  func.func @transform_2(%arg0: i32) -> (i32, i32) {
    %c0_i32 = arith.constant 0 : i32
    %c0_i32_0 = arith.constant 0 : i32
    %c0_i32_1 = arith.constant 0 : i32
    return %c0_i32, %c0_i32_0 : i32, i32
  }
  func.func @transform_3(%arg0: i32) -> (i32, i32) {
    %c0_i32 = arith.constant 0 : i32
    %c0_i32_0 = arith.constant 0 : i32
    return %arg0, %c0_i32 : i32, i32
  }
}

</mosaic_0001>

<bundles_post_ra>
// kernel: tpu_custom_call.1
= control target key start
LH: loop header
LB: loop body
LE: loop exit
PB: predicated region body
PF: predicated region fallthrough
CT: control target
= control target key end

     0   :  { %vm71_vm0 = vcmask 1043456   ;;  %s386_s0 = inlined_call_operand.vmem [shape: f32[16,100], index: 0, kind: input, shape index: {}]   ;;  %s387_s1 = inlined_call_operand.vmem [shape: f32[100,300], index: 1, kind: input, shape index: {}]   ;;  %s388_s2 = inlined_call_operand.vmem [shape: f32[1,300], index: 2, kind: input, shape index: {}]   ;;  %s389_s3 = inlined_call_operand.hbm [shape: f32[16,300], index: 3, kind: output, shape index: {}]  }
   0x1   :  { %v55_v0 = vld [vmem:[%s387_s1 + $0x130] sm:$0xf]  ;;  %v52_v1 = vld [vmem:[%s387_s1 + $0x118] sm:$0xff]  ;;  %v54_v2 = vld [vmem:[%s387_s1 + $0x128] sm:$0xf] }
   0x2   :  { %181 = vmatpush.msk.msra.mxu2 %vm71_vm0, %v55_v0  ;;  %v53_v3 = vld [vmem:[%s387_s1 + $0x120] sm:$0xf]  ;;  %178 = vmatpush.msk.msra.mxu1 %vm71_vm0, %v54_v2  ;;  %v51_v5 = vld [vmem:[%s387_s1 + $0x110] sm:$0xff]  ;;  %v50_v6 = vld [vmem:[%s387_s1 + $0x108] sm:$0xff] }
   0x3   :  { %v49_v4 = vld [vmem:[%s387_s1 + $0x100] sm:$0xff]  ;;  %184 = vmatpush.msk.msra.mxu3 %vm71_vm0, %v53_v3  ;;  %v48_v7 = vld [vmem:[%s387_s1 + $0xf8] sm:$0xff]  ;;  %v47_v8 = vld [vmem:[%s387_s1 + $0xf0] sm:$0xff]  ;;  %175 = vmatpush.msk.msra.mxu0 %vm71_vm0, %v53_v3 }
   0x4   :  { %131 = vmatpush.msra.mxu2 %v52_v1  ;;  %v46_v9 = vld [vmem:[%s387_s1 + $0xe8] sm:$0xff]  ;;  %108 = vmatpush.msra.mxu1 %v51_v5  ;;  %v45_v10 = vld [vmem:[%s387_s1 + $0xe0] sm:$0xff]  ;;  %v44_v11 = vld [vmem:[%s387_s1 + $0xd8] sm:$0xff] }
   0x5   :  { %185 = vmatpush.msra.mxu3 %v50_v6  ;;  %85 = vmatpush.msra.mxu0 %v50_v6  ;;  %v43_v12 = vld [vmem:[%s387_s1 + $0xd0] sm:$0xff]  ;;  %v42_v13 = vld [vmem:[%s387_s1 + $0xc8] sm:$0xff]  ;;  %v41_v14 = vld [vmem:[%s387_s1 + $0xc0] sm:$0xff] }
   0x6   :  { %132 = vmatpush.msra.mxu2 %v49_v4  ;;  %109 = vmatpush.msra.mxu1 %v48_v7  ;;  %v40_v15 = vld [vmem:[%s387_s1 + $0xb8] sm:$0xff]  ;;  %v39_v16 = vld [vmem:[%s387_s1 + $0xb0] sm:$0xff]  ;;  %v38_v17 = vld [vmem:[%s387_s1 + $0xa8] sm:$0xff] }
   0x7   :  { %186 = vmatpush.msra.mxu3 %v47_v8  ;;  %86 = vmatpush.msra.mxu0 %v47_v8  ;;  %v37_v18 = vld [vmem:[%s387_s1 + $0xa0] sm:$0xff]  ;;  %v36_v19 = vld [vmem:[%s387_s1 + $0x98] sm:$0xff]  ;;  %v35_v20 = vld [vmem:[%s387_s1 + $0x90] sm:$0xff] }
   0x8   :  { %133 = vmatpush.msra.mxu2 %v46_v9  ;;  %110 = vmatpush.msra.mxu1 %v45_v10  ;;  %v34_v21 = vld [vmem:[%s387_s1 + $0x88] sm:$0xff]  ;;  %v33_v22 = vld [vmem:[%s387_s1 + $0x80] sm:$0xff]  ;;  %v32_v23 = vld [vmem:[%s387_s1 + $0x78] sm:$0xff] }
   0x9   :  { %187 = vmatpush.msra.mxu3 %v44_v11  ;;  %87 = vmatpush.msra.mxu0 %v44_v11  ;;  %v31_v24 = vld [vmem:[%s387_s1 + $0x70] sm:$0xff] }
   0xa   :  { %134 = vmatpush.msra.mxu2 %v43_v12  ;;  %111 = vmatpush.msra.mxu1 %v42_v13 }
   0xb   :  { %188 = vmatpush.msra.mxu3 %v41_v14  ;;  %88 = vmatpush.msra.mxu0 %v41_v14 }
   0xc   :  { %135 = vmatpush.msra.mxu2 %v40_v15  ;;  %112 = vmatpush.msra.mxu1 %v39_v16 }
   0xd   :  { %189 = vmatpush.msra.mxu3 %v38_v17  ;;  %89 = vmatpush.msra.mxu0 %v38_v17 }
   0xe   :  { %136 = vmatpush.msra.mxu2 %v37_v18  ;;  %113 = vmatpush.msra.mxu1 %v36_v19 }
   0xf   :  { %190 = vmatpush.msra.mxu3 %v35_v20 }
  0x10   :  { %8 = vsyncpa [#allocation3], 0  ;;  %137 = vmatpush.msra.mxu2 %v34_v21  ;;  %v30_v25 = vld [vmem:[%s387_s1 + $0x68] sm:$0xff]  ;;  %v29_v26 = vld [vmem:[%s387_s1 + $0x60] sm:$0xff]  ;;  %90 = vmatpush.msra.mxu0 %v35_v20  ;;  %vm64_vm1 = vcmask 818176   ;;  %vm152_vm2 = vcmask 359424  }
  0x11   :  { %v28_v27 = vld [vmem:[%s387_s1 + $0x58] sm:$0xff]  ;;  %114 = vmatpush.msra.mxu1 %v33_v22  ;;  %191 = vmatpush.msra.mxu3 %v32_v23  ;;  %v27_v28 = vld [vmem:[%s387_s1 + $0x50] sm:$0xff]  ;;  %v26_v29 = vld [vmem:[%s387_s1 + $0x48] sm:$0xff]  ;;  %s163_s16 = sshll.u32 %s389_s3, 4  ;;  %s227_s17 = smov 384   ;;  %s164_s16 = int_to_ptr.hbm [resolvable:$true] %s163_s16 }
  0x12   :  { %138 = vmatpush.msra.mxu2 %v31_v24  ;;  %91 = vmatpush.msra.mxu0 %v32_v23  ;;  %v25_v30 = vld [vmem:[%s387_s1 + $0x40] sm:$0xff]  ;;  %v24_v31 = vld [vmem:[%s387_s1 + $0x38] sm:$0xff]  ;;  %v23_v32 = vld [vmem:[%s387_s1 + $0x30] sm:$0xff]  ;;  %s228_s18 = smov 24  }
  0x13   :  { %115 = vmatpush.msra.mxu1 %v30_v25  ;;  %192 = vmatpush.msra.mxu3 %v29_v26  ;;  %v22_v33 = vld [vmem:[%s387_s1 + $0x28] sm:$0xff]  ;;  %v21_v34 = vld [vmem:[%s387_s1 + $0x20] sm:$0xff]  ;;  %v20_v35 = vld [vmem:[%s387_s1 + $0x18] sm:$0xff] }
  0x14   :  { %139 = vmatpush.msra.mxu2 %v28_v27  ;;  %92 = vmatpush.msra.mxu0 %v29_v26  ;;  %v19_v36 = vld [vmem:[%s387_s1 + $0x10] sm:$0xff]  ;;  %v15_v37 = vld [vmem:[%s386_s0] sm:$0xff]  ;;  %v18_v38 = vld [vmem:[%s387_s1 + $0x8] sm:$0xff] }
  0x15   :  { %116 = vmatpush.msra.mxu1 %v27_v28  ;;  %193 = vmatpush.msra.mxu3 %v26_v29  ;;  %v17_v39 = vld [vmem:[%s387_s1] sm:$0xff]  ;;  %v16_v40 = vld [vmem:[%s386_s0 + $0x8] sm:$0xff]  ;;  %s226_s0 = smov [#allocation2]  }
  0x16   :  { %140 = vmatpush.msra.mxu2 %v25_v30  ;;  %93 = vmatpush.msra.mxu0 %v26_v29  ;;  %v56_v41 = vld [vmem:[%s388_s2] sm:$0x7]  ;;  %s161_s2 = sshll.u32 %s226_s0, 4  ;;  %s162_s2 = int_to_ptr.vmem [resolvable:$true] %s161_s2 }
  0x17   :  { %117 = vmatpush.msra.mxu1 %v24_v31  ;;  %194 = vmatpush.msra.mxu3 %v23_v32  ;;  %v59_v42 = vperm.slane %v56_v41, 1  ;;  %v58_v43 = vperm.slane %v56_v41, 0  ;;  %v60_v46 = vperm.slane %v56_v41, 2 }
  0x18   :  { %141 = vmatpush.msra.mxu2 %v22_v33  ;;  %94 = vmatpush.msra.mxu0 %v23_v32 }
  0x19   :  { %118 = vmatpush.msra.mxu1 %v21_v34  ;;  %195 = vmatpush.msra.mxu3 %v20_v35 }
  0x1a   :  { %142 = vmatpush.msra.mxu2 %v19_v36  ;;  %95 = vmatpush.msra.mxu0 %v20_v35 }
  0x1b   :  { %182 = vmatmul.msk.f32.vlgmr.msra.gmra.mxu2 %vm64_vm1, %v15_v37  ;;  %119 = vmatpush.msra.mxu1 %v18_v38 }
  0x1c   :  { %179 = vmatmul.msk.f32.vlgmr.msra.gmra.mxu1 %vm64_vm1, %v15_v37  ;;  %196 = vmatpush.msra.mxu3 %v17_v39 }
  0x1d   :  { %177 = vmatmul.msk.f32.vlgmr.msra.gmra.mxu3 %vm64_vm1, %v16_v40  ;;  %96 = vmatpush.msra.mxu0 %v17_v39 }
  0x1e   :  { %176 = vmatmul.msk.f32.vlgmr.msra.gmra.mxu0 %vm64_vm1, %v15_v37 }
  0x23   :  { %183 = vmatmul.msk.f32.gmra.mxu2 %vm64_vm1, %v16_v40 }
  0x24   :  { %180 = vmatmul.msk.f32.gmra.mxu1 %vm64_vm1, %v16_v40 }
  0x99   :  { %v121_v44 = vpop.f32.mrf.mxu1 }
  0x9a   :  { %v122_v45 = vadd.f32 %v121_v44, %v59_v42 }
  0x9b   :  { %v98_v47 = vpop.f32.mrf.mxu0 }
  0x9c   :  { %151 = vst [vmem:[#allocation2 + $0x8] sm:$0xff] %v122_v45  ;;  %v99_v48 = vadd.f32 %v98_v47, %v58_v43 }
  0x9e   :  { %v144_v49 = vpop.f32.mrf.mxu2  ;;  %150 = vst [vmem:[#allocation2] sm:$0xff] %v99_v48 }
  0x9f   :  { %v145_v50 = vadd.f32 %v144_v49, %v60_v46 }
  0xa0   :  { %v101_v51 = vpop.f32.mrf.mxu3 }
  0xa1   :  { %153 = vst.msk [vmem:[#allocation2 + $0x10] sm:$0xff] %vm152_vm2, %v145_v50  ;;  %v102_v52 = vadd.f32 %v101_v51, %v58_v43  ;;  %v124_v53 = vpop.f32.mrf.mxu1 }
  0xa2   :  { %v125_v54 = vadd.f32 %v124_v53, %v59_v42 }
  0xa3   :  { %154 = vst [vmem:[#allocation2 + $0x18] sm:$0xff] %v102_v52 }
  0xa4   :  { %155 = vst [vmem:[#allocation2 + $0x20] sm:$0xff] %v125_v54 }
  0xa6   :  { %v147_v55 = vpop.f32.mrf.mxu2 }
  0xa7   :  { %v148_v56 = vadd.f32 %v147_v55, %v60_v46 }
  0xa9   :  { %156 = vst.msk [vmem:[#allocation2 + $0x28] sm:$0xff] %vm152_vm2, %v148_v56 }
  0xaa   :  { %169 = dma.vmem_to_hbm [thread:$0]  %s162_s2, 768, %s164_s16, [#allocation3], %s227_s17, %s227_s17, %s228_s18  }
  0xab   :  { %224 = dma.done.wait [#allocation3], 768  }
  0xac   :  { %225 = vsyncadd [#allocation3], 4294966528 }
  0xad   :  { %174 = vsyncpa [#allocation3], 1 }

</bundles_post_ra>
